<compile_context>
chip_gen: v7x
topology: tpu7x:2x2x1
jax: 0.10.0
libtpu: 0.0.40
codegen_flags: <defaults>
</compile_context>

<pallas_src>
from functools import partial

import jax
import jax.numpy as jnp
from jax.experimental import pallas as pl
from jax.experimental.pallas import tpu as pltpu

NEG_SLOPE = 0.2  # GATConv default negative_slope
LANE = 128


def _ceil_to(v, m):
    return ((v + m - 1) // m) * m


def _pad2d(a, shape):
    return jnp.zeros(shape, jnp.float32).at[: a.shape[0], : a.shape[1]].set(a)


# ------- Stage 1: SAGEConv + ReLU + GAT source projection + attention logits (row-tiled) -------
def sage_kernel(x_ref, adj_ref, w_l_ref, b_l_ref, w_r_ref, w_gat_ref, att_comb_ref,
                xs_ref, a_att_ref, *, tm, f_in):
    row0 = pl.multiple_of(pl.program_id(0) * tm, tm)

    x_all = x_ref[...]                                      # (N, F_pad) f32; column f_in is all-ones
    adj_t = adj_ref[...].astype(jnp.float32)                # (TM, N), adj[i, j] = #edges j -> i

    # adj @ [x | 1]: cols 0..f_in-1 = neighbor sum, col f_in = in-degree (degree on the MXU,
    # no XLU row-sum).
    aggdeg = jnp.dot(adj_t, x_all, preferred_element_type=jnp.float32)    # (TM, F_pad)
    deg = aggdeg[:, f_in:f_in + 1]                           # (TM, 1)
    agg = aggdeg / jnp.maximum(deg, 1.0)                     # mean over neighbors (0 if none)

    x_tile = x_ref[pl.ds(row0, tm), :]                       # (TM, F_pad) root (target) features
    h = (jnp.dot(agg, w_l_ref[...], preferred_element_type=jnp.float32)
         + b_l_ref[...]
         + jnp.dot(x_tile, w_r_ref[...], preferred_element_type=jnp.float32))
    h = jnp.maximum(h, 0.0)                                  # ReLU

    # GAT lin_src for this row tile (padded per-head layout: head hd at cols [hd*H_pad, ...)).
    xs = jnp.dot(h, w_gat_ref[...], preferred_element_type=jnp.float32)   # (TM, heads*H_pad)
    xs_ref[...] = xs

    # Per-node attention logits, computed once here (not per row tile in stage 2):
    #   a_att[t, hd]         = att_dst[hd] . xs[row0+t, head hd]
    #   a_att[t, heads + hd] = att_src[hd] . xs[row0+t, head hd]
    a_att_ref[...] = jnp.dot(xs, att_comb_ref[...], preferred_element_type=jnp.float32)


# --------------- Stage 2: GAT attention + ReLU + Linear (row-tiled) ---------------
def gat_kernel(adj_ref, xs_ref, a_att_ref, a_srcT_ref, b_gat_ref, w_lin_ref, b_lin_ref,
               out_ref, *, tm, heads, h_pad):
    adj_t = adj_ref[...].astype(jnp.float32)                 # (TM, N) edge multiplicities
    # Non-edge mask hoisted out of the head loop (additive bias instead of 4x vselect).
    neg_bias = jnp.where(adj_t > 0.0, 0.0, -1e30)

    xs_all = xs_ref[...]                                      # (N, heads*H_pad)
    a_att = a_att_ref[...]                                    # (TM, 128): col hd = a_dst[hd]
    a_srcT = a_srcT_ref[...]                                  # (8, N): row hd = a_src[hd] per source

    acc = jnp.zeros((tm, h_pad), jnp.float32)
    # TODO(synk): for very large TM*N, switch to an online/blocked softmax over source columns
    # and a fori_loop over heads to bound the (TM, N) temporaries' live range.
    for hd in range(heads):
        x_h = xs_all[:, hd * h_pad:(hd + 1) * h_pad]          # (N, H_pad)
        e = a_att[:, hd:hd + 1] + a_srcT[hd:hd + 1, :]        # (TM, N): e[i, j]
        e = jnp.where(e > 0.0, e, NEG_SLOPE * e) + neg_bias   # LeakyReLU + non-edge mask
        m = jnp.max(e, axis=1, keepdims=True)
        p = jnp.exp(e - m) * adj_t                            # duplicate edges counted
        denom = jnp.maximum(jnp.sum(p, axis=1, keepdims=True), 1e-16)
        # Normalize the (TM, H_pad) aggregate, not the (TM, N) probability matrix.
        acc = acc + jnp.dot(p, x_h, preferred_element_type=jnp.float32) / denom

    h2 = jnp.maximum(acc * (1.0 / heads) + b_gat_ref[...], 0.0)          # mean heads + bias, ReLU
    out_ref[...] = (jnp.dot(h2, w_lin_ref[...], preferred_element_type=jnp.float32)
                    + b_lin_ref[...]).astype(out_ref.dtype)


# --------------- Wrapper: padding / repacking glue + pallas_calls ---------------
def hetero_graph_forward(x, adj, params, *, heads=4, tm=None):
    n, f_in = x.shape
    hidden = params["w_sage_l"].shape[1]
    out_ch = params["w_lin"].shape[1]

    f_pad = _ceil_to(f_in + 1, LANE)       # +1 ones column for the in-degree trick
    h_pad = _ceil_to(hidden, LANE)
    o_pad = _ceil_to(out_ch, LANE)

    if tm is None:
        tm = min(n, 256)
    assert n % tm == 0 and tm % 16 == 0, "row tile must divide N and be a multiple of 16 (bf16 adj)"

    # ---- layout plumbing (plain JAX) ----
    x_pad = jnp.zeros((n, f_pad), jnp.float32).at[:, :f_in].set(x).at[:, f_in].set(1.0)
    adj_bf16 = adj.astype(jnp.bfloat16)    # integer edge counts <= 256 are exact in bf16

    w_l = _pad2d(params["w_sage_l"], (f_pad, h_pad))
    b_l = _pad2d(params["b_sage_l"], (1, h_pad))
    w_r = _pad2d(params["w_sage_r"], (f_pad, h_pad))

    # Per-head GAT projection + fused attention-vector matrix:
    #   att_comb[:, hd]         holds att_dst[hd] in head hd's row block,
    #   att_comb[:, heads + hd] holds att_src[hd] in head hd's row block.
    w_gat = jnp.zeros((h_pad, heads * h_pad), jnp.float32)
    att_comb = jnp.zeros((heads * h_pad, LANE), jnp.float32)
    for hd in range(heads):
        w_gat = w_gat.at[:hidden, hd * h_pad:hd * h_pad + hidden].set(
            params["w_gat"][:, hd * hidden:(hd + 1) * hidden])
        att_comb = att_comb.at[hd * h_pad:hd * h_pad + hidden, hd].set(params["att_dst"][hd])
        att_comb = att_comb.at[hd * h_pad:hd * h_pad + hidden, heads + hd].set(params["att_src"][hd])

    b_gat = _pad2d(params["b_gat"], (1, h_pad))
    w_lin = _pad2d(params["w_lin"], (h_pad, o_pad))
    b_lin = _pad2d(params["b_lin"], (1, o_pad))

    grid = (n // tm,)
    cparams = pltpu.CompilerParams(dimension_semantics=("parallel",),
                                   vmem_limit_bytes=48 * 1024 * 1024)

    def resident(shape):  # whole-array block, constant index_map
        return pl.BlockSpec(shape, lambda i: (0, 0))

    # ---- stage 1: SAGEConv + ReLU + GAT lin_src + attention logits ----
    xs, a_att = pl.pallas_call(
        partial(sage_kernel, tm=tm, f_in=f_in),
        grid=grid,
        out_shape=(jax.ShapeDtypeStruct((n, heads * h_pad), jnp.float32),
                   jax.ShapeDtypeStruct((n, LANE), jnp.float32)),
        in_specs=[resident((n, f_pad)),
                  pl.BlockSpec((tm, n), lambda i: (i, 0)),
                  resident((f_pad, h_pad)), resident((1, h_pad)), resident((f_pad, h_pad)),
                  resident((h_pad, heads * h_pad)), resident((heads * h_pad, LANE))],
        out_specs=(pl.BlockSpec((tm, heads * h_pad), lambda i: (i, 0)),
                   pl.BlockSpec((tm, LANE), lambda i: (i, 0))),
        compiler_params=cparams,
    )(x_pad, adj_bf16, w_l, b_l, w_r, w_gat, att_comb)

    # Transpose the per-node SOURCE attention logits once (tiny (N, heads) XLA op) so stage 2
    # never re-projects all N source nodes per row tile.
    a_srcT = jnp.zeros((8, n), jnp.float32).at[:heads, :].set(a_att[:, heads:2 * heads].T)

    # ---- stage 2: GAT attention + ReLU + Linear ----
    out_pad = pl.pallas_call(
        partial(gat_kernel, tm=tm, heads=heads, h_pad=h_pad),
        grid=grid,
        out_shape=jax.ShapeDtypeStruct((n, o_pad), jnp.float32),
        in_specs=[pl.BlockSpec((tm, n), lambda i: (i, 0)),
                  resident((n, heads * h_pad)),
                  pl.BlockSpec((tm, LANE), lambda i: (i, 0)),
                  resident((8, n)),
                  resident((1, h_pad)), resident((h_pad, o_pad)), resident((1, o_pad))],
        out_specs=pl.BlockSpec((tm, o_pad), lambda i: (i, 0)),
        compiler_params=cparams,
    )(adj_bf16, xs, a_att, a_srcT, b_gat, w_lin, b_lin)

    return out_pad[:, :out_ch]


# --------------- Pure-JAX reference (correctness check) ---------------
def reference_forward(x, adj, params, *, heads=4):
    hidden = params["w_sage_l"].shape[1]
    deg = jnp.sum(adj, axis=1, keepdims=True)
    agg = (adj @ x) / jnp.maximum(deg, 1.0)
    h = agg @ params["w_sage_l"] + params["b_sage_l"] + x @ params["w_sage_r"]
    h = jnp.maximum(h, 0.0)
    xs = h @ params["w_gat"]
    acc = jnp.zeros((x.shape[0], hidden), jnp.float32)
    for hd in range(heads):
        x_h = xs[:, hd * hidden:(hd + 1) * hidden]
        a_dst = x_h @ params["att_dst"][hd]
        a_src = x_h @ params["att_src"][hd]
        e = a_dst[:, None] + a_src[None, :]
        e = jnp.where(e > 0.0, e, NEG_SLOPE * e)
        e = jnp.where(adj > 0.0, e, -1e30)
        p = jnp.exp(e - jnp.max(e, axis=1, keepdims=True)) * adj
        w = p / jnp.maximum(jnp.sum(p, axis=1, keepdims=True), 1e-16)
        acc = acc + w @ x_h
    h2 = jnp.maximum(acc / heads + params["b_gat"], 0.0)
    return h2 @ params["w_lin"] + params["b_lin"]


def init_params(key, in_features, hidden, out_channels, heads):
    ks = jax.random.split(key, 8)
    s = 0.1
    return {
        # SAGEConv: lin_l (neighbor path, bias=True), lin_r (root path, bias=False)
        "w_sage_l": s * jax.random.normal(ks[0], (in_features, hidden), jnp.float32),
        "b_sage_l": s * jax.random.normal(ks[1], (1, hidden), jnp.float32),
        "w_sage_r": s * jax.random.normal(ks[2], (in_features, hidden), jnp.float32),
        # GATConv: lin_src (bias=False), per-head attention vectors, output bias (concat=False)
        "w_gat": s * jax.random.normal(ks[3], (hidden, heads * hidden), jnp.float32),
        "att_src": s * jax.random.normal(ks[4], (heads, hidden), jnp.float32),
        "att_dst": s * jax.random.normal(ks[5], (heads, hidden), jnp.float32),
        "b_gat": s * jax.random.normal(ks[6], (1, hidden), jnp.float32),
        # Final Linear
        "w_lin": s * jax.random.normal(ks[7], (hidden, out_channels), jnp.float32),
        "b_lin": jnp.zeros((1, out_channels), jnp.float32),
    }


if __name__ == "__main__":
    N, F_IN, HIDDEN, OUT, HEADS, E, TM = 64, 16, 32, 8, 4, 192, 16

    key = jax.random.PRNGKey(0)
    k_x, k_src, k_dst, k_par = jax.random.split(key, 4)

    x = jax.random.normal(k_x, (N, F_IN), jnp.float32)
    src = jax.random.randint(k_src, (E,), 0, N)
    dst = jax.random.randint(k_dst, (E,), 0, N)
    edge_index = jnp.stack([src, dst])   # (2, E), PyG convention: row 0 = source, row 1 = target

    # Densify edge list into adjacency counts: adj[i, j] = #edges j -> i (plain-JAX glue)
    adj = jnp.zeros((N, N), jnp.float32).at[edge_index[1], edge_index[0]].add(1.0)

    params = init_params(k_par, F_IN, HIDDEN, OUT, HEADS)

    out = hetero_graph_forward(x, adj, params, heads=HEADS, tm=TM)
    out = jax.block_until_ready(out)

    ref = reference_forward(x, adj, params, heads=HEADS)
    assert out.shape == (N, OUT)
    assert jnp.allclose(out, ref, atol=1e-4, rtol=1e-4), "kernel/reference mismatch"

    print("KERNEL_OK")
</pallas_src>

<mosaic_0001>
module attributes {stable_mosaic.version = 11 : i64} {
  func.func @sage_kernel(%arg0: i32, %arg1: memref<64x128xf32, #tpu.memory_space<vmem>>, %arg2: memref<16x64xbf16, #tpu.memory_space<vmem>>, %arg3: memref<128x128xf32, #tpu.memory_space<vmem>>, %arg4: memref<1x128xf32, #tpu.memory_space<vmem>>, %arg5: memref<128x128xf32, #tpu.memory_space<vmem>>, %arg6: memref<128x512xf32, #tpu.memory_space<vmem>>, %arg7: memref<512x128xf32, #tpu.memory_space<vmem>>, %arg8: memref<16x512xf32, #tpu.memory_space<vmem>>, %arg9: memref<16x128xf32, #tpu.memory_space<vmem>>) attributes {dimension_semantics = [#tpu.dimension_semantics<parallel>], iteration_bounds = array<i64: 4>, scalar_prefetch = 0 : i64, scratch_operands = 0 : i64, tpu.core_type = #tpu.core_type<tc>, window_params = [{pipeline_mode = #tpu.pipeline_mode<synchronous>, transform_indices = @transform_0, window_bounds = array<i64: 64, 128>}, {transform_indices = @transform_1, window_bounds = array<i64: 16, 64>}, {pipeline_mode = #tpu.pipeline_mode<synchronous>, transform_indices = @transform_2, window_bounds = array<i64: 128, 128>}, {pipeline_mode = #tpu.pipeline_mode<synchronous>, transform_indices = @transform_3, window_bounds = array<i64: 1, 128>}, {pipeline_mode = #tpu.pipeline_mode<synchronous>, transform_indices = @transform_4, window_bounds = array<i64: 128, 128>}, {pipeline_mode = #tpu.pipeline_mode<synchronous>, transform_indices = @transform_5, window_bounds = array<i64: 128, 512>}, {pipeline_mode = #tpu.pipeline_mode<synchronous>, transform_indices = @transform_6, window_bounds = array<i64: 512, 128>}, {transform_indices = @transform_7, window_bounds = array<i64: 16, 512>}, {transform_indices = @transform_8, window_bounds = array<i64: 16, 128>}]} {
    %c16_i32 = arith.constant 16 : i32
    %0 = arith.muli %arg0, %c16_i32 : i32
    %1 = tpu.assume_multiple %0, 16 : i32
    %c0 = arith.constant 0 : index
    %c0_0 = arith.constant 0 : index
    %2 = vector.load %arg1[%c0, %c0_0] : memref<64x128xf32, #tpu.memory_space<vmem>>, vector<64x128xf32>
    %c0_1 = arith.constant 0 : index
    %c0_2 = arith.constant 0 : index
    %3 = vector.load %arg2[%c0_1, %c0_2] : memref<16x64xbf16, #tpu.memory_space<vmem>>, vector<16x64xbf16>
    %4 = arith.extf %3 : vector<16x64xbf16> to vector<16x64xf32>
    %cst = arith.constant dense<0.000000e+00> : vector<16x128xf32>
    %5 = tpu.matmul %4, %2, %cst {dimension_numbers = #tpu.dot_dimension_numbers<[1], [0], [0], [1], [0, 0, 1, 1], [], []>} : vector<16x64xf32>, vector<64x128xf32>, vector<16x128xf32> -> vector<16x128xf32>
    %6 = vector.extract_strided_slice %5 {offsets = [0, 16], sizes = [16, 1], strides = [1, 1]} : vector<16x128xf32> to vector<16x1xf32>
    %cst_3 = arith.constant 1.000000e+00 : f32
    %7 = vector.broadcast %cst_3 : f32 to vector<16x1xf32>
    %8 = arith.maximumf %6, %7 : vector<16x1xf32>
    %9 = vector.broadcast %8 : vector<16x1xf32> to vector<16x128xf32>
    %10 = arith.divf %5, %9 : vector<16x128xf32>
    %11 = arith.index_cast %1 : i32 to index
    %c0_4 = arith.constant 0 : index
    %12 = vector.load %arg1[%11, %c0_4] : memref<64x128xf32, #tpu.memory_space<vmem>>, vector<16x128xf32>
    %c0_5 = arith.constant 0 : index
    %c0_6 = arith.constant 0 : index
    %13 = vector.load %arg3[%c0_5, %c0_6] : memref<128x128xf32, #tpu.memory_space<vmem>>, vector<128x128xf32>
    %cst_7 = arith.constant dense<0.000000e+00> : vector<16x128xf32>
    %14 = tpu.matmul %10, %13, %cst_7 {dimension_numbers = #tpu.dot_dimension_numbers<[1], [0], [0], [1], [0, 0, 1, 1], [], []>} : vector<16x128xf32>, vector<128x128xf32>, vector<16x128xf32> -> vector<16x128xf32>
    %c0_8 = arith.constant 0 : index
    %c0_9 = arith.constant 0 : index
    %15 = vector.load %arg4[%c0_8, %c0_9] : memref<1x128xf32, #tpu.memory_space<vmem>>, vector<1x128xf32>
    %16 = vector.broadcast %15 : vector<1x128xf32> to vector<16x128xf32>
    %17 = arith.addf %14, %16 : vector<16x128xf32>
    %c0_10 = arith.constant 0 : index
    %c0_11 = arith.constant 0 : index
    %18 = vector.load %arg5[%c0_10, %c0_11] : memref<128x128xf32, #tpu.memory_space<vmem>>, vector<128x128xf32>
    %cst_12 = arith.constant dense<0.000000e+00> : vector<16x128xf32>
    %19 = tpu.matmul %12, %18, %cst_12 {dimension_numbers = #tpu.dot_dimension_numbers<[1], [0], [0], [1], [0, 0, 1, 1], [], []>} : vector<16x128xf32>, vector<128x128xf32>, vector<16x128xf32> -> vector<16x128xf32>
    %20 = arith.addf %17, %19 : vector<16x128xf32>
    %cst_13 = arith.constant 0.000000e+00 : f32
    %21 = vector.broadcast %cst_13 : f32 to vector<16x128xf32>
    %22 = arith.maximumf %20, %21 : vector<16x128xf32>
    %c0_14 = arith.constant 0 : index
    %c0_15 = arith.constant 0 : index
    %23 = vector.load %arg6[%c0_14, %c0_15] : memref<128x512xf32, #tpu.memory_space<vmem>>, vector<128x512xf32>
    %cst_16 = arith.constant dense<0.000000e+00> : vector<16x512xf32>
    %24 = tpu.matmul %22, %23, %cst_16 {dimension_numbers = #tpu.dot_dimension_numbers<[1], [0], [0], [1], [0, 0, 1, 1], [], []>} : vector<16x128xf32>, vector<128x512xf32>, vector<16x512xf32> -> vector<16x512xf32>
    %c0_17 = arith.constant 0 : index
    %c0_18 = arith.constant 0 : index
    %25 = vector.load %arg8[%c0_17, %c0_18] : memref<16x512xf32, #tpu.memory_space<vmem>>, vector<16x512xf32>
    tpu.vector_store %arg8[%c0_17, %c0_18], %24 {strides = array<i32>} : memref<16x512xf32, #tpu.memory_space<vmem>>, vector<16x512xf32>,
    %c0_19 = arith.constant 0 : index
    %c0_20 = arith.constant 0 : index
    %26 = vector.load %arg7[%c0_19, %c0_20] : memref<512x128xf32, #tpu.memory_space<vmem>>, vector<512x128xf32>
    %cst_21 = arith.constant dense<0.000000e+00> : vector<16x128xf32>
    %27 = tpu.matmul %24, %26, %cst_21 {dimension_numbers = #tpu.dot_dimension_numbers<[1], [0], [0], [1], [0, 0, 1, 1], [], []>} : vector<16x512xf32>, vector<512x128xf32>, vector<16x128xf32> -> vector<16x128xf32>
    %c0_22 = arith.constant 0 : index
    %c0_23 = arith.constant 0 : index
    %28 = vector.load %arg9[%c0_22, %c0_23] : memref<16x128xf32, #tpu.memory_space<vmem>>, vector<16x128xf32>
    tpu.vector_store %arg9[%c0_22, %c0_23], %27 {strides = array<i32>} : memref<16x128xf32, #tpu.memory_space<vmem>>, vector<16x128xf32>,
    return
  }
  func.func @transform_0(%arg0: i32) -> (i32, i32) {
    %c0_i32 = arith.constant 0 : i32
    %c0_i32_0 = arith.constant 0 : i32
    %c0_i32_1 = arith.constant 0 : i32
    return %c0_i32, %c0_i32_0 : i32, i32
  }
  func.func @transform_1(%arg0: i32) -> (i32, i32) {
    %c0_i32 = arith.constant 0 : i32
    %c0_i32_0 = arith.constant 0 : i32
    return %arg0, %c0_i32 : i32, i32
  }
  func.func @transform_2(%arg0: i32) -> (i32, i32) {
    %c0_i32 = arith.constant 0 : i32
    %c0_i32_0 = arith.constant 0 : i32
    %c0_i32_1 = arith.constant 0 : i32
    return %c0_i32, %c0_i32_0 : i32, i32
  }
  func.func @transform_3(%arg0: i32) -> (i32, i32) {
    %c0_i32 = arith.constant 0 : i32
    %c0_i32_0 = arith.constant 0 : i32
    %c0_i32_1 = arith.constant 0 : i32
    return %c0_i32, %c0_i32_0 : i32, i32
  }
  func.func @transform_4(%arg0: i32) -> (i32, i32) {
    %c0_i32 = arith.constant 0 : i32
    %c0_i32_0 = arith.constant 0 : i32
    %c0_i32_1 = arith.constant 0 : i32
    return %c0_i32, %c0_i32_0 : i32, i32
  }
  func.func @transform_5(%arg0: i32) -> (i32, i32) {
    %c0_i32 = arith.constant 0 : i32
    %c0_i32_0 = arith.constant 0 : i32
    %c0_i32_1 = arith.constant 0 : i32
    return %c0_i32, %c0_i32_0 : i32, i32
  }
  func.func @transform_6(%arg0: i32) -> (i32, i32) {
    %c0_i32 = arith.constant 0 : i32
    %c0_i32_0 = arith.constant 0 : i32
    %c0_i32_1 = arith.constant 0 : i32
    return %c0_i32, %c0_i32_0 : i32, i32
  }
  func.func @transform_7(%arg0: i32) -> (i32, i32) {
    %c0_i32 = arith.constant 0 : i32
    %c0_i32_0 = arith.constant 0 : i32
    return %arg0, %c0_i32 : i32, i32
  }
  func.func @transform_8(%arg0: i32) -> (i32, i32) {
    %c0_i32 = arith.constant 0 : i32
    %c0_i32_0 = arith.constant 0 : i32
    return %arg0, %c0_i32 : i32, i32
  }
}

</mosaic_0001>

<bundles_post_ra>
// kernel: tpu_custom_call.1
= control target key start
LH: loop header
LB: loop body
LE: loop exit
PB: predicated region body
PF: predicated region fallthrough
CT: control target
= control target key end

     0   :  { %s2667_s0 = inlined_call_operand.hbm [shape: f32[64,128], index: 0, kind: input, shape index: {}]   ;;  %s2668_s1 = inlined_call_operand.hbm [shape: bf16[64,64], index: 1, kind: input, shape index: {}]   ;;  %s2669_s2 = inlined_call_operand.hbm [shape: f32[128,128], index: 2, kind: input, shape index: {}]   ;;  %s2670_s3 = inlined_call_operand.vmem [shape: f32[1,128], index: 3, kind: input, shape index: {}]   ;;  %s2671_s4 = inlined_call_operand.hbm [shape: f32[128,128], index: 4, kind: input, shape index: {}]   ;;  %s2672_s5 = inlined_call_operand.hbm [shape: f32[128,512], index: 5, kind: input, shape index: {}]   ;;  %s2673_s6 = inlined_call_operand.hbm [shape: f32[512,128], index: 6, kind: input, shape index: {}]   ;;  %s2674_s7 = inlined_call_operand.hbm [shape: f32[64,512], index: 7, kind: output, shape index: {0}]   ;;  %s2675_s8 = inlined_call_operand.hbm [shape: f32[64,128], index: 8, kind: output, shape index: {1}]  }
   0x1   :  { %2683 = sst [smem:[#allocation25_spill]] %s2667_s0 }
   0x2   :  { %14 = vsyncpa [#allocation3], 0 }
   0x3   :  { %15 = vsyncpa [#allocation6], 0 }
   0x4   :  { %17 = vsyncpa [#allocation6 + $0x1], 0 }
   0x5   :  { %18 = vsyncpa [#allocation9], 0 }
   0x6   :  { %19 = vsyncpa [#allocation12], 0 }
   0x7   :  { %20 = vsyncpa [#allocation4], 0 }
   0x8   :  { %22 = vsyncpa [#allocation4 + $0x1], 0 }
   0x9   :  { %23 = vsyncpa [#allocation15], 0 }
   0xa   :  { %25 = vsyncpa [#allocation15 + $0x1], 0  ;;  %s2287_s27 = smov 0   ;;  %s2289_s28 = smov 0  }
   0xb   :  { %s2291_s29 = smov 0   ;;  %s2293_s30 = smov 0  }
   0xc LB: > { %2684 = sst [smem:[#allocation23_spill]] %s2208_s27  ;;  %s2308_s9 = sadd.s32 4294967295, %s2220_s30   ;;  %s2220_s30 = sphi %s2293_s30, %s2714_s30   ;;  %s2216_s29 = sphi %s2291_s29, %s2713_s29   ;;  %s2212_s28 = sphi %s2289_s28, %s2712_s28   ;;  %s2208_s27 = sphi %s2287_s27, %s2711_s27  }
   0xd   : > { %s1353_s10 = sadd.s32 4294967294, %s2220_s30   ;;  %p72_p0 = scmp.ne.s32.totalorder %s2212_s28, %s2208_s27 }
   0xe   : > { %p2676_p1 = scmp.eq.s32.totalorder %s2308_s9, 0  ;;  %p207_p3 = scmp.eq.s32.totalorder %s1353_s10, 3 }
   0xf   : > { %p1354_p5 = scmp.ge.s32.totalorder %s2220_s30, 1  ;;  %p240_p7 = scmp.lt.s32.totalorder %s2220_s30, 5 }
  0x10   : > { %p2317_p4 = por %p2676_p1, %p72_p0  ;;  %p2322_p6 = por %p207_p3, %p72_p0 }
  0x11   : > { %p2327_p8 = pnand %p1354_p5, %p240_p7  ;;  %s2222_s14 = smov [#allocation7]  }
  0x12   : > { %s2685_s11 = scalar_select %p2317_p4, 1, 0 }
  0x13   : > { %s2686_s12 = scalar_select %p2322_p6, 1, 0 }
  0x14   : > { %s2688_s13 = scalar_select %p2327_p8, 1, 0 }
  0x15   : > { %2687 = sst [smem:[#allocation24_spill]] %s2686_s12  ;;  %p1843_p9 = pneg %p2327_p8 }
  0x16   : > { %s265_s15 = sshll.u32 %s2222_s14, 4  ;;  %s2223_s17 = smov [#allocation8]   ;;  %s2333_s15 = int_to_ptr.vmem [resolvable:$true] %s265_s15 }
  0x17   : > { %p2337_p10 = pnand %p1843_p9, %p2676_p1  ;;  %s281_s18 = sshll.u32 %s2223_s17, 4  ;;  %s2341_s18 = int_to_ptr.vmem [resolvable:$true] %s281_s18 }
  0x18   : > { %s2224_s19 = smov [#allocation2]   ;;  %s1936_s23 = scalar_lea.hbm %s2669_s2, 2048 }
  0x19   : > { %s2343_s20 = sshll.u32 %s2224_s19, 4  ;;  %p1937_p11 = scmp.ne.s32.totalorder %s2669_s2, %s1936_s23  ;;  %s253_s20 = int_to_ptr.vmem [resolvable:$true] %s2343_s20 }
  0x1a   : > { %p2353_p12 = pneg %p2337_p10  ;;  %p1943_p3 = scmp.lt.u32.totalorder %s1936_s23, %s2669_s2 }
  0x1c   : > { %p1939_p13 = pnand %p2353_p12, %p1937_p11 }
  0x1e   : > { %p1940_p0 = pneg %p1939_p13 }
  0x20   : > { %p1945_p5 = pnand %p1943_p3, %p1940_p0 }
  0x22   : > { %1948 = shalt.err (!%p1945_p5)
}
  0x23   : > { %s1949_s17 = scalar_lea.vmem %s2333_s15, 2048  ;;  %p1957_p2 = scmp.lt.s32.totalorder %s2333_s15, %s2333_s15 }
  0x24   : > { %p1950_p7 = scmp.ne.s32.totalorder %s2333_s15, %s1949_s17  ;;  %p1958_p6 = scmp.lt.s32.totalorder %s1949_s17, %s1949_s17 }
  0x26   : > { %p1952_p9 = pnand %p1950_p7, %p2353_p12  ;;  %p1959_p11 = por %p1958_p6, %p1957_p2 }
  0x28   : > { %p1953_p1 = pneg %p1952_p9 }
  0x2a   : > { %p1960_p13 = pnand %p1959_p11, %p1953_p1 }
  0x2c   : > { %1963 = shalt.err (!%p1960_p13)
}
  0x2d   : > { %s2681_s19 = smov 128   ;;  %s2682_s21 = smov 8  }
  0x2e   : > { %1849 = dma.hbm_to_vmem [thread:$0]  (!%p2337_p10), %s2669_s2, 2048, %s2333_s15, [#allocation6], %s2681_s19, %s2681_s19, %s2682_s21  }
  0x2f   : > { %s1964_s10 = scalar_lea.hbm %s2671_s4, 2048 }
  0x30   : > { %p1965_p1 = scmp.ne.s32.totalorder %s2671_s4, %s1964_s10  ;;  %p1971_p0 = scmp.lt.u32.totalorder %s1964_s10, %s2671_s4 }
  0x32   : > { %p1967_p2 = pnand %p1965_p1, %p2353_p12 }
  0x34   : > { %p1968_p6 = pneg %p1967_p2 }
  0x36   : > { %p1973_p3 = pnand %p1971_p0, %p1968_p6 }
  0x38   : > { %1976 = shalt.err (!%p1973_p3)
}
  0x39   : > { %s1977_s15 = scalar_lea.vmem %s2341_s18, 2048  ;;  %p1985_p11 = scmp.lt.s32.totalorder %s2341_s18, %s2341_s18 }
  0x3a   : > { %p1978_p5 = scmp.ne.s32.totalorder %s2341_s18, %s1977_s15  ;;  %p1986_p13 = scmp.lt.s32.totalorder %s1977_s15, %s1977_s15 }
  0x3c   : > { %p1980_p7 = pnand %p1978_p5, %p2353_p12  ;;  %p1987_p1 = por %p1986_p13, %p1985_p11 }
  0x3e   : > { %p1981_p9 = pneg %p1980_p7 }
  0x40   : > { %p1988_p2 = pnand %p1987_p1, %p1981_p9 }
  0x42   : > { %1991 = shalt.err (!%p1988_p2)
}
  0x43   : > { %1852 = dma.hbm_to_vmem [thread:$0]  (!%p2337_p10), %s2671_s4, 2048, %s2341_s18, [#allocation9], %s2681_s19, %s2681_s19, %s2682_s21  }
  0x44   : > { %s2691_s0 = sld [smem:[#allocation25_spill]] }
  0x4a   : > { %s1992_s24 = scalar_lea.hbm %s2691_s0, 1024 }
  0x4b   : > { %p1993_p6 = scmp.ne.s32.totalorder %s2691_s0, %s1992_s24  ;;  %p1999_p5 = scmp.lt.u32.totalorder %s1992_s24, %s2691_s0 }
  0x4d   : > { %p1995_p0 = pnand %p1993_p6, %p2353_p12 }
  0x4f   : > { %p1996_p3 = pneg %p1995_p0 }
  0x51   : > { %p2001_p7 = pnand %p1999_p5, %p1996_p3 }
  0x53   : > { %2004 = shalt.err (!%p2001_p7)
}
  0x54   : > { %s2005_s15 = scalar_lea.vmem %s253_s20, 1024  ;;  %p2013_p1 = scmp.lt.s32.totalorder %s253_s20, %s253_s20 }
  0x55   : > { %p2006_p9 = scmp.ne.s32.totalorder %s253_s20, %s2005_s15  ;;  %p2014_p2 = scmp.lt.s32.totalorder %s2005_s15, %s2005_s15 }
  0x57   : > { %p2008_p11 = pnand %p2006_p9, %p2353_p12  ;;  %p2015_p4 = por %p2014_p2, %p2013_p1 }
  0x59   : > { %p2009_p13 = pneg %p2008_p11 }
  0x5b   : > { %p2016_p8 = pnand %p2015_p4, %p2009_p13 }
  0x5d   : > { %2019 = shalt.err (!%p2016_p8)
}
  0x5e   : > { %1846 = dma.hbm_to_vmem [thread:$0]  (!%p2337_p10), %s2691_s0, 1024, %s253_s20, [#allocation3], %s2681_s19, %s2681_s19, %s2682_s21  }
  0x5f   : > { %s2227_s12 = smov [#allocation10]   ;;  %s2020_s25 = scalar_lea.hbm %s2672_s5, 8192 }
  0x60   : > { %s294_s22 = sshll.u32 %s2227_s12, 4  ;;  %p2021_p4 = scmp.ne.s32.totalorder %s2672_s5, %s2020_s25  ;;  %s295_s22 = int_to_ptr.vmem [resolvable:$true] %s294_s22 }
  0x61   : > { %p2027_p0 = scmp.lt.u32.totalorder %s2020_s25, %s2672_s5 }
  0x62   : > { %p2023_p8 = pnand %p2021_p4, %p2353_p12 }
  0x64   : > { %p2024_p6 = pneg %p2023_p8 }
  0x66   : > { %p2029_p3 = pnand %p2027_p0, %p2024_p6 }
  0x68   : > { %2032 = shalt.err (!%p2029_p3)
}
  0x69   : > { %s2033_s20 = scalar_lea.vmem %s295_s22, 8192  ;;  %p2041_p11 = scmp.lt.s32.totalorder %s295_s22, %s295_s22 }
  0x6a   : > { %p2034_p5 = scmp.ne.s32.totalorder %s295_s22, %s2033_s20  ;;  %p2042_p13 = scmp.lt.s32.totalorder %s2033_s20, %s2033_s20 }
  0x6c   : > { %p2036_p7 = pnand %p2034_p5, %p2353_p12  ;;  %p2043_p1 = por %p2042_p13, %p2041_p11 }
  0x6e   : > { %p2037_p9 = pneg %p2036_p7 }
  0x70   : > { %p2044_p2 = pnand %p2043_p1, %p2037_p9 }
  0x72   : > { %2047 = shalt.err (!%p2044_p2)
}
  0x73   : > { %s2228_s18 = smov 512   ;;  %s2229_s27 = smov 32  }
  0x74   : > { %1855 = dma.hbm_to_vmem [thread:$0]  (!%p2337_p10), %s2672_s5, 8192, %s295_s22, [#allocation9], %s2228_s18, %s2228_s18, %s2229_s27  }
  0x75   : > { %s2230_s24 = smov [#allocation11]   ;;  %s2444_s10 = sadd.s32 1, %s2220_s30  }
  0x76   : > { %s307_s25 = sshll.u32 %s2230_s24, 4  ;;  %s2048_s15 = scalar_lea.hbm %s2673_s6, 8192  ;;  %s308_s25 = int_to_ptr.vmem [resolvable:$true] %s307_s25 }
  0x77   : > { %p2049_p4 = scmp.ne.s32.totalorder %s2673_s6, %s2048_s15  ;;  %p2055_p0 = scmp.lt.u32.totalorder %s2048_s15, %s2673_s6 }
  0x79   : > { %p2051_p8 = pnand %p2049_p4, %p2353_p12 }
  0x7b   : > { %p2052_p6 = pneg %p2051_p8 }
  0x7d   : > { %p2057_p3 = pnand %p2055_p0, %p2052_p6 }
  0x7f   : > { %2060 = shalt.err (!%p2057_p3)
}
  0x80   : > { %s2061_s22 = scalar_lea.vmem %s308_s25, 8192  ;;  %p2069_p11 = scmp.lt.s32.totalorder %s308_s25, %s308_s25 }
  0x81   : > { %p2062_p5 = scmp.ne.s32.totalorder %s308_s25, %s2061_s22  ;;  %p2070_p13 = scmp.lt.s32.totalorder %s2061_s22, %s2061_s22 }
  0x83   : > { %p2064_p7 = pnand %p2062_p5, %p2353_p12  ;;  %p2071_p1 = por %p2070_p13, %p2069_p11 }
  0x85   : > { %p2065_p9 = pneg %p2064_p7 }
  0x87   : > { %p2072_p2 = pnand %p2071_p1, %p2065_p9 }
  0x89   : > { %2075 = shalt.err (!%p2072_p2)
}
  0x8a   : > { %s2692_s19 = smov 8   ;;  %s2693_s18 = smov 128  }
  0x8b   : > { %1858 = dma.hbm_to_vmem [thread:$0]  (!%p2337_p10), %s2673_s6, 8192, %s308_s25, [#allocation12], %s2693_s18, %s2693_s18, %s2692_s19  }
  0x8c   : > { %s56_s16 = ssub.s32 %s2220_s30, %s2444_s10  ;;  %s59_s26 = sadd.s32 1, %s2216_s29 }
  0x8d   : > { %p57_p12 = scmp.eq.s32.totalorder %s56_s16, 0  ;;  %p66_p4 = scmp.ne.s32.totalorder %s2216_s29, %s2212_s28 }
  0x8e   : > { %p67_p8 = scmp.eq.s32.totalorder %s2220_s30, 0  ;;  %p1875_p6 = scmp.lt.s32.totalorder %s2220_s30, 4 }
  0x8f   : > { %s2475_s27 = scalar_select %p57_p12, %s2216_s29, %s59_s26  }
  0x90   : > { %p68_p0 = por %p67_p8, %p66_p4  ;;  %p2694_p3 = scmp.eq.s32.totalorder %s2308_s9, 3 }
  0x91   : > { %s321_s23 = sand.u32 1, %s2220_s30   ;;  %s323_s24 = sand.u32 1, %s2216_s29  }
  0x92   : > { %p2479_p5 = por %p2694_p3, %p66_p4  ;;  %s1361_s14 = sshll.u32 %s323_s24, 3 }
  0x93   : > { %s1386_s17 = sshll.u32 %s2220_s30, 7  ;;  %s325_s22 = scalar_lea.vmem [#allocation5], %s1361_s14 }
  0x94   : > { %s2489_s20 = scalar_lea.hbm %s2668_s1, %s1386_s17  ;;  %s332_s19 = sshll.u32 %s325_s22, 4  ;;  %s2491_s19 = int_to_ptr.vmem [resolvable:$true] %s332_s19 }
  0x95   : > { %p2493_p10 = pnand %p1875_p6, %p68_p0  ;;  %s2497_s0 = scalar_lea.sflag [#allocation6], %s321_s23 }
  0x96   : > { %s2076_s21 = scalar_lea.hbm %s2489_s20, 128  ;;  %s2081_s24 = scalar_lea.hbm %s2668_s1, 512 }
  0x97   : > { %p2077_p7 = scmp.ne.s32.totalorder %s2489_s20, %s2076_s21  ;;  %p2078_p9 = pneg %p2493_p10 }
  0x98   : > { %p2082_p1 = scmp.lt.u32.totalorder %s2489_s20, %s2668_s1  ;;  %p2083_p2 = scmp.lt.u32.totalorder %s2081_s24, %s2076_s21 }
  0x99   : > { %p2079_p11 = pnand %p2078_p9, %p2077_p7  ;;  %p2085_p4 = scmp.lt.u32.totalorder %s2076_s21, %s2489_s20 }
  0x9a   : > { %p2084_p12 = por %p2083_p2, %p2082_p1 }
  0x9b   : > { %p2080_p13 = pneg %p2079_p11 }
  0x9c   : > { %p2086_p8 = por %p2085_p4, %p2084_p12 }
  0x9e   : > { %p2087_p6 = pnand %p2086_p8, %p2080_p13 }
  0xa0   : > { %2090 = shalt.err (!%p2087_p6)
}
  0xa1   : > { %s2091_s23 = scalar_lea.vmem %s2491_s19, 128  ;;  %s2231_s15 = smov [#allocation5]  }
  0xa2   : > { %p2092_p0 = scmp.ne.s32.totalorder %s2491_s19, %s2091_s23  ;;  %s2096_s25 = sshll.u32 %s2231_s15, 4  ;;  %s2097_s25 = int_to_ptr.vmem [resolvable:$false] %s2096_s25 }
  0xa3   : > { %s2098_s22 = scalar_lea.vmem %s2097_s25, 256  ;;  %p2099_p11 = scmp.lt.s32.totalorder %s2491_s19, %s2097_s25 }
  0xa4   : > { %p2094_p3 = pnand %p2092_p0, %p2078_p9  ;;  %p2100_p1 = scmp.lt.s32.totalorder %s2098_s22, %s2091_s23 }
  0xa6   : > { %p2095_p7 = pneg %p2094_p3  ;;  %p2101_p2 = por %p2100_p1, %p2099_p11 }
  0xa8   : > { %p2102_p12 = pnand %p2101_p2, %p2095_p7 }
  0xaa   : > { %2105 = shalt.err (!%p2102_p12)
}
  0xab   : > { %s2232_s21 = smov 64   ;;  %s2233_s16 = smov 4  }
  0xac   : > { %1862 = dma.hbm_to_vmem [thread:$0]  (!%p2493_p10), %s2489_s20, 128, %s2491_s19, %s2497_s0, %s2232_s21, %s2232_s21, %s2233_s16  }
  0xad   : > { %p2697_p9 = scmp.ne.s32.totalorder %s2688_s13, 0 }
  0xae   : > { %p2698_p13 = scmp.eq.s32.totalorder (!%p2697_p9), %s2308_s9, 0 }
  0xaf   : > { %344 = sbr.rel (%p2697_p9) target bundleno = 1307 (0x51b), region = 48 }
  0xb6   : > { %2179 = dma.done.wait (%p2698_p13), [#allocation3], 1024   ;;  %p2699_p4 = pmov %p2698_p13 }
  0xb7   : > { %s350_s26 = sand.u32 1, %s2308_s9   ;;  %s2533_s24 = sand.u32 1, %s2212_s28  }
  0xb8   : > { %2181 = vsyncadd (%p2699_p4), [#allocation3], 4294966272  ;;  %s1366_s14 = sshll.u32 %s2533_s24, 3  ;;  %s351_s17 = scalar_lea.sflag [#allocation6], %s350_s26 }
  0xb9   : > { %s354_s18 = scalar_lea.vmem [#allocation5], %s1366_s14  ;;  %p2700_p10 = scmp.ne.s32.totalorder %s2685_s11, 0 }
  0xbb   : > { %2183 = dma.done.wait (%p2700_p10), %s351_s17, 128  }
  0xbc   : > { %2185 = vsyncadd (%p2700_p10), %s351_s17, 4294967168  ;;  %p2701_p8 = pmov %p2699_p4 }
  0xbd   : > { %p2702_p6 = pmov %p2699_p4 }
  0xbe   : > { %2187 = dma.done.wait (%p2701_p8), [#allocation6], 2048  }
  0xbf   : > { %2189 = vsyncadd (%p2702_p6), [#allocation6], 4294965248  ;;  %p2703_p0 = pmov %p2699_p4 }
  0xc1   : > { %2191 = dma.done.wait (%p2703_p0), [#allocation9], 10240   ;;  %p2704_p3 = pmov %p2703_p0 }
  0xc2   : > { %p2705_p7 = pmov %p2703_p0 }
  0xc3   : > { %2193 = vsyncadd (%p2704_p3), [#allocation9], 4294957056 }
  0xc4   : > { %2195 = dma.done.wait (%p2705_p7), [#allocation12], 8192   ;;  %p2706_p11 = pmov %p2703_p0 }
  0xc5   : > { %v412_v0 = vld [vmem:[#allocation2] sm:$0xff]  ;;  %v413_v1 = vld [vmem:[#allocation2 + $0x8] sm:$0xff]  ;;  %v414_v2 = vld [vmem:[#allocation2 + $0x10] sm:$0xff]  ;;  %vm424_vm0 = vcmask 523264   ;;  %v2234_v15 = vmov 16   ;;  %s1373_s11 = sshll.u32 %s2308_s9, 4 }
  0xc6   : > { %2197 = vsyncadd (%p2706_p11), [#allocation12], 4294959104  ;;  %v1605_v3 = vpack.c.bf16 %v413_v1, %v412_v0  ;;  %v415_v4 = vld [vmem:[#allocation2 + $0x18] sm:$0xff]  ;;  %v416_v6 = vld [vmem:[#allocation2 + $0x20] sm:$0xff]  ;;  %1931 = vset.pattern.permute.xlu0 %v2234_v15  ;;  %s2566_s13 = scalar_lea.vmem [#allocation2], %s1373_s11  ;;  %s1371_s0 = sshll.u32 %s2533_s24, 6 }
  0xc7   : > { %v1609_v5 = vpack.c.bf16 %v415_v4, %v414_v2  ;;  %v417_v7 = vld [vmem:[#allocation2 + $0x28] sm:$0xff]  ;;  %v418_v11 = vld [vmem:[#allocation2 + $0x30] sm:$0xff]  ;;  %v419_v12 = vld [vmem:[#allocation2 + $0x38] sm:$0xff]  ;;  %s400_s23 = scalar_lea.vmem [#allocation13], %s1371_s0  ;;  %s1388_s25 = sshll.u32 %s2308_s9, 10 }
  0xc8   : > { %v1391_v8 = vld [vmem:[%s354_s18] sm:$0xff]   ;;  %1606 = vmatprep.subr.bf16.mxu0 %v1605_v3  ;;  %v1613_v10 = vpack.c.bf16 %v417_v7, %v416_v6  ;;  %v1617_v13 = vpack.c.bf16 %v419_v12, %v418_v11  ;;  %v525_v16 = vld [vmem:[#allocation7] sm:$0xff]  ;;  %v526_v17 = vld [vmem:[#allocation7 + $0x8] sm:$0xff]  ;;  %s1180_s15 = sshll.u32 %s400_s23, 4  ;;  %s2591_s16 = scalar_lea.hbm %s2674_s7, %s1388_s25  ;;  %s2585_s15 = int_to_ptr.vmem [resolvable:$true] %s1180_s15 }
  0xc9   : > { %v1392_v9 = vunpack.c.l.bf16 %v1391_v8  ;;  %1608 = vmatpush3.bf16.msra.mxu0 %v1605_v3  ;;  %v1393_v14 = vunpack.c.h.bf16 %v1391_v8  ;;  %v527_v18 = vld [vmem:[#allocation7 + $0x10] sm:$0xff]  ;;  %v1621_v19 = vpack.c.bf16 %v526_v17, %v525_v16  ;;  %v528_v20 = vld [vmem:[#allocation7 + $0x18] sm:$0xff]  ;;  %v529_v22 = vld [vmem:[#allocation7 + $0x20] sm:$0xff]  ;;  %s1161_s26 = scalar_lea.sflag [#allocation4], %s2533_s24  ;;  %s2106_s14 = scalar_lea.vmem %s2585_s15, 1024 }
  0xca   : > { %1610 = vmatprep.subr.bf16.mxu0 %v1609_v5  ;;  %v1625_v21 = vpack.c.bf16 %v528_v20, %v527_v18  ;;  %v530_v23 = vld [vmem:[#allocation7 + $0x28] sm:$0xff]  ;;  %v531_v25 = vld [vmem:[#allocation7 + $0x30] sm:$0xff]  ;;  %v532_v26 = vld [vmem:[#allocation7 + $0x38] sm:$0xff]  ;;  %p2107_p1 = scmp.ne.s32.totalorder %s2585_s15, %s2106_s14  ;;  %s2236_s17 = smov [#allocation13]  }
  0xcb   : > { %1532 = vmatprep.mubr.msk.f32.mxu0 %vm424_vm0, %v1392_v9  ;;  %1622 = vmatprep.subr.bf16.mxu1 %v1621_v19  ;;  %v1629_v24 = vpack.c.bf16 %v530_v23, %v529_v22  ;;  %v1633_v27 = vpack.c.bf16 %v532_v26, %v531_v25  ;;  %v533_v30 = vld [vmem:[#allocation7 + $0x40] sm:$0xff]  ;;  %v534_v31 = vld [vmem:[#allocation7 + $0x48] sm:$0xff]  ;;  %v535_v34 = vld [vmem:[#allocation7 + $0x50] sm:$0xff]  ;;  %s2110_s18 = sshll.u32 %s2236_s17, 4  ;;  %s2111_s18 = int_to_ptr.vmem [resolvable:$false] %s2110_s18 }
  0xcc   : > { %1624 = vmatpush3.bf16.msra.mxu1 %v1621_v19  ;;  %v1637_v33 = vpack.c.bf16 %v534_v31, %v533_v30  ;;  %v536_v35 = vld [vmem:[#allocation7 + $0x58] sm:$0xff]  ;;  %v537_v38 = vld [vmem:[#allocation7 + $0x60] sm:$0xff]  ;;  %v538_v39 = vld [vmem:[#allocation7 + $0x68] sm:$0xff]  ;;  %p2108_p2 = pnand %p2107_p1, %p2479_p5  ;;  %s2112_s11 = scalar_lea.vmem %s2111_s18, 2048 }
  0xcd   : > { %1612 = vmatpush3.bf16.msra.mxu0 %v1609_v5  ;;  %1626 = vmatprep.subr.bf16.mxu1 %v1625_v21  ;;  %v1641_v37 = vpack.c.bf16 %v536_v35, %v535_v34  ;;  %v539_v40 = vld [vmem:[#allocation7 + $0x70] sm:$0xff]  ;;  %v1645_v41 = vpack.c.bf16 %v538_v39, %v537_v38  ;;  %v540_v42 = vld [vmem:[#allocation7 + $0x78] sm:$0xff]  ;;  %v623_v44 = vld [vmem:[#allocation8] sm:$0xff]  ;;  %p2113_p9 = scmp.lt.s32.totalorder %s2585_s15, %s2111_s18  ;;  %p2114_p13 = scmp.lt.s32.totalorder %s2112_s11, %s2106_s14 }
  0xce   : > { %1614 = vmatprep.subr.bf16.mxu0 %v1613_v10  ;;  %v1649_v43 = vpack.c.bf16 %v540_v42, %v539_v40  ;;  %v624_v45 = vld [vmem:[#allocation8 + $0x8] sm:$0xff]  ;;  %v718_v49 = vld [vmem:[#allocation10] sm:$0xff]  ;;  %v625_v31 = vld [vmem:[#allocation8 + $0x10] sm:$0xff]  ;;  %p2109_p12 = pneg %p2108_p2 }
  0xcf   : > { %v2560_v46 = vpack.c.bf16 %v624_v45, %v623_v44  ;;  %v719_v47 = vld [vmem:[#allocation10 + $0x8] sm:$0xff]  ;;  %v722_v51 = vld [vmem:[#allocation10 + $0x20] sm:$0xff]  ;;  %v630_v40 = vld [vmem:[#allocation8 + $0x38] sm:$0xff]  ;;  %p2115_p4 = por %p2114_p13, %p2113_p9 }
  0xd0   : > { %1628 = vmatpush3.bf16.msra.mxu1 %v1625_v21  ;;  %v723_v48 = vld [vmem:[#allocation10 + $0x28] sm:$0xff]  ;;  %v1687_v54 = vpack.c.bf16 %v722_v51, %v718_v49  ;;  %v726_v56 = vld [vmem:[#allocation10 + $0x40] sm:$0xff]  ;;  %v633_v44 = vld [vmem:[#allocation8 + $0x50] sm:$0xff] }
  0xd1   : > { %1616 = vmatpush3.bf16.msra.mxu0 %v1613_v10  ;;  %1630 = vmatprep.subr.bf16.mxu1 %v1629_v24  ;;  %v1685_v50 = vpack.c.bf16 %v723_v48, %v719_v47  ;;  %v727_v52 = vld [vmem:[#allocation10 + $0x48] sm:$0xff]  ;;  %v730_v57 = vld [vmem:[#allocation10 + $0x60] sm:$0xff]  ;;  %v634_v45 = vld [vmem:[#allocation8 + $0x58] sm:$0xff]  ;;  %p2116_p10 = pnand %p2115_p4, %p2109_p12 }
  0xd2   : > { %1618 = vmatprep.subr.bf16.mxu0 %v1617_v13  ;;  %v731_v53 = vld [vmem:[#allocation10 + $0x68] sm:$0xff]  ;;  %v1691_v60 = vpack.c.bf16 %v730_v57, %v726_v56  ;;  %v734_v62 = vld [vmem:[#allocation10 + $0x80] sm:$0xff]  ;;  %v1673_v47 = vpack.c.bf16 %v634_v45, %v633_v44  ;;  %v638_v51 = vld [vmem:[#allocation8 + $0x78] sm:$0xff] }
  0xd3   : > { %v1689_v55 = vpack.c.bf16 %v731_v53, %v727_v52  ;;  %v735_v58 = vld [vmem:[#allocation10 + $0x88] sm:$0xff]  ;;  %v738_v63 = vld [vmem:[#allocation10 + $0xa0] sm:$0xff]  ;;  %v524_v53 = vld [vmem:[%s2566_s13 + $0x8] sm:$0xff] }
  0xd4   : > { %1632 = vmatpush3.bf16.msra.mxu1 %v1629_v24  ;;  %v739_v59 = vld [vmem:[#allocation10 + $0xa8] sm:$0xff]  ;;  %v1695_v2 = vpack.c.bf16 %v738_v63, %v734_v62  ;;  %v742_v4 = vld [vmem:[#allocation10 + $0xc0] sm:$0xff]  ;;  %v2235_v63 = vmov 0.0   ;;  %v1376_v45 = vld [vmem:[%s2670_s3] ss:$0 sm:$0xff] }
  0xd5   : > { %1620 = vmatpush3.bf16.msra.mxu0 %v1617_v13  ;;  %1634 = vmatprep.subr.bf16.mxu1 %v1633_v27  ;;  %v1693_v61 = vpack.c.bf16 %v739_v59, %v735_v58  ;;  %v743_v0 = vld [vmem:[#allocation10 + $0xc8] sm:$0xff]  ;;  %v746_v5 = vld [vmem:[#allocation10 + $0xe0] sm:$0xff] }
  0xd6   : > { %1686 = vmatprep.subr.bf16.mxu0 %v1685_v50  ;;  %v747_v1 = vld [vmem:[#allocation10 + $0xe8] sm:$0xff]  ;;  %v1699_v8 = vpack.c.bf16 %v746_v5, %v742_v4  ;;  %v750_v10 = vld [vmem:[#allocation10 + $0x100] sm:$0xff]  ;;  %v637_v50 = vld [vmem:[#allocation8 + $0x70] sm:$0xff] }
  0xd7   : > { %v1697_v3 = vpack.c.bf16 %v747_v1, %v743_v0  ;;  %v751_v6 = vld [vmem:[#allocation10 + $0x108] sm:$0xff]  ;;  %v754_v11 = vld [vmem:[#allocation10 + $0x120] sm:$0xff]  ;;  %v1681_v52 = vpack.c.bf16 %v638_v51, %v637_v50  ;;  %v962_v5 = vld [vmem:[#allocation11 + $0x90] sm:$0xff] }
  0xd8   : > { %1533 = vmatmul.mubr.msk.f32.vlgmr.msra.gmra.mrb[0].mxu0 %vm424_vm0, %v1393_v14  ;;  %1636 = vmatpush3.bf16.msra.mxu1 %v1633_v27  ;;  %v755_v7 = vld [vmem:[#allocation10 + $0x128] sm:$0xff]  ;;  %v1703_v14 = vpack.c.bf16 %v754_v11, %v750_v10  ;;  %v758_v16 = vld [vmem:[#allocation10 + $0x140] sm:$0xff]  ;;  %v947_v10 = vld [vmem:[#allocation11 + $0x18] sm:$0xff] }
  0xd9   : > { %1638 = vmatprep.subr.bf16.mxu1 %v1637_v33  ;;  %1688 = vmatpush1.bf16.msra.mxu0 %v1687_v54  ;;  %v1701_v9 = vpack.c.bf16 %v755_v7, %v751_v6  ;;  %v759_v12 = vld [vmem:[#allocation10 + $0x148] sm:$0xff]  ;;  %v762_v17 = vld [vmem:[#allocation10 + $0x160] sm:$0xff]  ;;  %v963_v6 = vld [vmem:[#allocation11 + $0x98] sm:$0xff] }
  0xda   : > { %1690 = vmatprep.subr.bf16.mxu0 %v1689_v55  ;;  %v763_v13 = vld [vmem:[#allocation10 + $0x168] sm:$0xff]  ;;  %v1707_v20 = vpack.c.bf16 %v762_v17, %v758_v16  ;;  %v766_v22 = vld [vmem:[#allocation10 + $0x180] sm:$0xff]  ;;  %846 = vmatprep.mubr.f32.mxu0 %v2235_v63  ;;  %v966_v17 = vld [vmem:[#allocation11 + $0xb0] sm:$0xff] }
  0xdb   : > { %v1705_v15 = vpack.c.bf16 %v763_v13, %v759_v12  ;;  %v767_v18 = vld [vmem:[#allocation10 + $0x188] sm:$0xff]  ;;  %v770_v23 = vld [vmem:[#allocation10 + $0x1a0] sm:$0xff]  ;;  %v729_v50 = vld [vmem:[#allocation10 + $0x58] sm:$0xff] }
  0xdc   : > { %1640 = vmatpush3.bf16.msra.mxu1 %v1637_v33  ;;  %v771_v19 = vld [vmem:[#allocation10 + $0x1a8] sm:$0xff]  ;;  %v1711_v24 = vpack.c.bf16 %v770_v23, %v766_v22  ;;  %v631_v42 = vld [vmem:[#allocation8 + $0x40] sm:$0xff]  ;;  %v951_v22 = vld [vmem:[#allocation11 + $0x38] sm:$0xff] }
  0xdd   : > { %1642 = vmatprep.subr.bf16.mxu1 %v1641_v37  ;;  %1692 = vmatpush1.bf16.msra.mxu0 %v1691_v60  ;;  %v1709_v21 = vpack.c.bf16 %v771_v19, %v767_v18  ;;  %v628_v38 = vld [vmem:[#allocation8 + $0x28] sm:$0xff]  ;;  %v774_v57 = vld [vmem:[#allocation10 + $0x1c0] sm:$0xff]  ;;  %v721_v60 = vld [vmem:[#allocation10 + $0x18] sm:$0xff] }
  0xde   : > { %1694 = vmatprep.subr.bf16.mxu0 %v1693_v61  ;;  %v636_v48 = vld [vmem:[#allocation8 + $0x68] sm:$0xff]  ;;  %v778_v58 = vld [vmem:[#allocation10 + $0x1e0] sm:$0xff]  ;;  %v725_v61 = vld [vmem:[#allocation10 + $0x38] sm:$0xff] }
  0xdf   : > { %v775_v54 = vld [vmem:[#allocation10 + $0x1c8] sm:$0xff]  ;;  %v1715_v59 = vpack.c.bf16 %v778_v58, %v774_v57  ;;  %v1717_v62 = vpack.c.bf16 %v725_v61, %v721_v60  ;;  %v960_v0 = vld [vmem:[#allocation11 + $0x80] sm:$0xff]  ;;  %v967_v18 = vld [vmem:[#allocation11 + $0xb8] sm:$0xff] }
  0xe0   : > { %1644 = vmatpush3.bf16.msra.mxu1 %v1641_v37  ;;  %v627_v37 = vld [vmem:[#allocation8 + $0x20] sm:$0xff]  ;;  %v779_v55 = vld [vmem:[#allocation10 + $0x1e8] sm:$0xff]  ;;  %v733_v51 = vld [vmem:[#allocation10 + $0x78] sm:$0xff] }
  0xe1   : > { %1646 = vmatprep.subr.bf16.mxu1 %v1645_v41  ;;  %1696 = vmatpush1.bf16.msra.mxu0 %v1695_v2  ;;  %v1661_v39 = vpack.c.bf16 %v628_v38, %v627_v37  ;;  %v1713_v56 = vpack.c.bf16 %v779_v55, %v775_v54  ;;  %v961_v1 = vld [vmem:[#allocation11 + $0x88] sm:$0xff]  ;;  %v944_v2 = vld [vmem:[#allocation11] sm:$0xff]  ;;  %v728_v57 = vld [vmem:[#allocation10 + $0x50] sm:$0xff] }
  0xe2   : > { %1698 = vmatprep.subr.bf16.mxu0 %v1697_v3  ;;  %v1749_v3 = vpack.c.bf16 %v961_v1, %v960_v0  ;;  %v945_v4 = vld [vmem:[#allocation11 + $0x8] sm:$0xff]  ;;  %v964_v11 = vld [vmem:[#allocation11 + $0xa0] sm:$0xff]  ;;  %v732_v58 = vld [vmem:[#allocation10 + $0x70] sm:$0xff] }
  0xe3   : > { %v1751_v7 = vpack.c.bf16 %v945_v4, %v944_v2  ;;  %v965_v12 = vld [vmem:[#allocation11 + $0xa8] sm:$0xff]  ;;  %v968_v23 = vld [vmem:[#allocation11 + $0xc0] sm:$0xff]  ;;  %v741_v60 = vld [vmem:[#allocation10 + $0xb8] sm:$0xff]  ;;  %v1723_v61 = vpack.c.bf16 %v732_v58, %v728_v57 }
  0xe4   : > { %1648 = vmatpush3.bf16.msra.mxu1 %v1645_v41  ;;  %v949_v16 = vld [vmem:[#allocation11 + $0x28] sm:$0xff]  ;;  %v972_v37 = vld [vmem:[#allocation11 + $0xe0] sm:$0xff]  ;;  %v736_v1 = vld [vmem:[#allocation10 + $0x90] sm:$0xff] }
  0xe5   : > { %1650 = vmatprep.subr.bf16.mxu1 %v1649_v43  ;;  %1700 = vmatpush1.bf16.msra.mxu0 %v1699_v8  ;;  %v1753_v8 = vpack.c.bf16 %v963_v6, %v962_v5  ;;  %v973_v38 = vld [vmem:[#allocation11 + $0xe8] sm:$0xff]  ;;  %v740_v2 = vld [vmem:[#allocation10 + $0xb0] sm:$0xff]  ;;  %v749_v4 = vld [vmem:[#allocation10 + $0xf8] sm:$0xff] }
  0xe6   : > { %1702 = vmatprep.subr.bf16.mxu0 %v1701_v9  ;;  %v946_v9 = vld [vmem:[#allocation11 + $0x10] sm:$0xff]  ;;  %v1727_v5 = vpack.c.bf16 %v740_v2, %v736_v1  ;;  %v983_v58 = vld [vmem:[#allocation11 + $0x138] sm:$0xff]  ;;  %v985_v1 = vld [vmem:[#allocation11 + $0x148] sm:$0xff] }
  0xe7   : > { %v1755_v13 = vpack.c.bf16 %v947_v10, %v946_v9  ;;  %v753_v9 = vld [vmem:[#allocation10 + $0x118] sm:$0xff]  ;;  %v982_v57 = vld [vmem:[#allocation11 + $0x130] sm:$0xff] }
  0xe8   : > { %1652 = vmatpush3.bf16.msra.mxu1 %v1649_v43  ;;  %v757_v10 = vld [vmem:[#allocation10 + $0x138] sm:$0xff]  ;;  %v1002_v2 = vld [vmem:[#allocation11 + $0x1d0] sm:$0xff] }
  0xe9   : > { %1654 = vmatprep.subr.bf16.mxu1 %v2560_v46  ;;  %1704 = vmatpush1.bf16.msra.mxu0 %v1703_v14  ;;  %v1757_v14 = vpack.c.bf16 %v965_v12, %v964_v11  ;;  %v1733_v12 = vpack.c.bf16 %v757_v10, %v753_v9  ;;  %v1005_v9 = vld [vmem:[#allocation11 + $0x1e8] sm:$0xff] }
  0xea   : > { %1706 = vmatprep.subr.bf16.mxu0 %v1705_v15  ;;  %v948_v15 = vld [vmem:[#allocation11 + $0x20] sm:$0xff] }
  0xeb   : > { %v1759_v19 = vpack.c.bf16 %v949_v16, %v948_v15  ;;  %v761_v15 = vld [vmem:[#allocation10 + $0x158] sm:$0xff] }
  0xec   : > { %v765_v16 = vld [vmem:[#allocation10 + $0x178] sm:$0xff] }
  0xed   : > { %1708 = vmatpush1.bf16.msra.mxu0 %v1707_v20  ;;  %v1761_v20 = vpack.c.bf16 %v967_v18, %v966_v17  ;;  %v1737_v18 = vpack.c.bf16 %v765_v16, %v761_v15  ;;  %v1007_v15 = vld [vmem:[#allocation11 + $0x1f8] sm:$0xff] }
  0xee   : > { %1710 = vmatprep.subr.bf16.mxu0 %v1709_v21  ;;  %v950_v21 = vld [vmem:[#allocation11 + $0x30] sm:$0xff] }
  0xf1   : > { %1712 = vmatpush1.bf16.msra.mxu0 %v1711_v24  ;;  %v969_v24 = vld [vmem:[#allocation11 + $0xc8] sm:$0xff] }
  0xf2   : > { %1714 = vmatprep.subr.bf16.mxu0 %v1713_v56  ;;  %v1721_v56 = vpack.c.bf16 %v733_v51, %v729_v50  ;;  %v980_v50 = vld [vmem:[#allocation11 + $0x120] sm:$0xff] }
  0xf5   : > { %1716 = vmatpush1.bf16.msra.mxu0 %v1715_v59  ;;  %v737_v59 = vld [vmem:[#allocation10 + $0x98] sm:$0xff] }
  0xf6   : > { %1718 = vmatprep.subr.bf16.mxu0 %v1717_v62  ;;  %v1725_v0 = vpack.c.bf16 %v741_v60, %v737_v59  ;;  %v1000_v59 = vld [vmem:[#allocation11 + $0x1c0] sm:$0xff]  ;;  %v1001_v60 = vld [vmem:[#allocation11 + $0x1c8] sm:$0xff] }
 0x1ab   : > { %v2554_v28 = vpop.f32.mrb[0].mxu0 }
 0x1ac   : > { %v2556_v29 = vpop.f32.mrb[1].mxu0  ;;  %v507_v36 = vmax.f32 %v2554_v28, 1.0 }
 0x1ad   : > { %v506_v32 = vmax.f32 %v2556_v29, 1.0 }
 0x1af   : > { %510 = vperm.xlu0 %1931, %v506_v32   ;;  %v626_v32 = vld [vmem:[#allocation8 + $0x18] sm:$0xff] }
 0x1b0   : > { %v1657_v35 = vpack.c.bf16 %v626_v32, %v625_v31  ;;  %v970_v31 = vld [vmem:[#allocation11 + $0xd0] sm:$0xff]  ;;  %v971_v32 = vld [vmem:[#allocation11 + $0xd8] sm:$0xff] }
 0x1b3   : > { %515 = vperm.xlu0 %1931, %v507_v36   ;;  %v523_v36 = vld [vmem:[%s2566_s13] sm:$0xff] }
 0x22e   : > { %v511_v25 = vpop.permute.xlu0 %510 }
 0x22f   : > { %1932 = vrcp.f32 %v511_v25  ;;  %v1763_v25 = vpack.c.bf16 %v951_v22, %v950_v21  ;;  %v769_v21 = vld [vmem:[#allocation10 + $0x198] sm:$0xff] }
 0x230   : > { %v773_v22 = vld [vmem:[#allocation10 + $0x1b8] sm:$0xff] }
 0x232   : > { %v516_v26 = vpop.permute.xlu0 %515 }
 0x233   : > { %1934 = vrcp.f32 %v516_v26  ;;  %v1765_v26 = vpack.c.bf16 %v969_v24, %v968_v23  ;;  %v1741_v24 = vpack.c.bf16 %v773_v22, %v769_v21 }
 0x239   : > { %v1933_v27 = vpop.eup %1932 }
 0x23a   : > { %v519_v30 = vmul.f32 %v1933_v27, %v2556_v29  ;;  %v629_v29 = vld [vmem:[#allocation8 + $0x30] sm:$0xff]  ;;  %v952_v27 = vld [vmem:[#allocation11 + $0x40] sm:$0xff] }
 0x23b   : > { %v1665_v41 = vpack.c.bf16 %v630_v40, %v629_v29  ;;  %v1773_v29 = vpack.c.bf16 %v973_v38, %v972_v37  ;;  %v956_v40 = vld [vmem:[#allocation11 + $0x60] sm:$0xff]  ;;  %v959_v37 = vld [vmem:[#allocation11 + $0x78] sm:$0xff] }
 0x23c   : > { %1567 = vmatprep.mubr.f32.mxu1 %v519_v30  ;;  %v953_v30 = vld [vmem:[#allocation11 + $0x48] sm:$0xff] }
 0x23d   : > { %v1935_v33 = vpop.eup %1934 }
 0x23e   : > { %v521_v34 = vmul.f32 %v1935_v33, %v2554_v28  ;;  %v632_v28 = vld [vmem:[#allocation8 + $0x48] sm:$0xff]  ;;  %v1767_v33 = vpack.c.bf16 %v953_v30, %v952_v27  ;;  %v777_v27 = vld [vmem:[#allocation10 + $0x1d8] sm:$0xff] }
 0x23f   : > { %v1669_v43 = vpack.c.bf16 %v632_v28, %v631_v42  ;;  %v974_v42 = vld [vmem:[#allocation11 + $0xf0] sm:$0xff]  ;;  %v975_v28 = vld [vmem:[#allocation11 + $0xf8] sm:$0xff] }
 0x240   : > { %1568 = vmatmul.mubr.f32.vlgmr.msra.gmra.mrb[0].mxu1 %v521_v34  ;;  %v1769_v34 = vpack.c.bf16 %v971_v32, %v970_v31  ;;  %v1777_v44 = vpack.c.bf16 %v975_v28, %v974_v42  ;;  %v781_v30 = vld [vmem:[#allocation10 + $0x1f8] sm:$0xff]  ;;  %v977_v42 = vld [vmem:[#allocation11 + $0x108] sm:$0xff] }
 0x241   : > { %1656 = vmatpush3.bf16.msra.mxu1 %v2560_v46  ;;  %1602 = vmatprep.mubr.f32.mxu1 %v523_v36  ;;  %v635_v46 = vld [vmem:[#allocation8 + $0x60] sm:$0xff]  ;;  %v955_v36 = vld [vmem:[#allocation11 + $0x58] sm:$0xff]  ;;  %v1745_v32 = vpack.c.bf16 %v781_v30, %v777_v27 }
 0x242   : > { %1658 = vmatprep.subr.bf16.mxu1 %v1657_v35  ;;  %v1677_v49 = vpack.c.bf16 %v636_v48, %v635_v46  ;;  %v720_v46 = vld [vmem:[#allocation10 + $0x10] sm:$0xff] }
 0x243   : > { %v724_v48 = vld [vmem:[#allocation10 + $0x30] sm:$0xff] }
 0x245   : > { %1660 = vmatpush3.bf16.msra.mxu1 %v1657_v35  ;;  %v954_v35 = vld [vmem:[#allocation11 + $0x50] sm:$0xff] }
 0x246   : > { %1662 = vmatprep.subr.bf16.mxu1 %v1661_v39 }
 0x249   : > { %1664 = vmatpush3.bf16.msra.mxu1 %v1661_v39  ;;  %v1771_v39 = vpack.c.bf16 %v955_v36, %v954_v35  ;;  %v958_v36 = vld [vmem:[#allocation11 + $0x70] sm:$0xff] }
 0x24a   : > { %1666 = vmatprep.subr.bf16.mxu1 %v1665_v41  ;;  %v1779_v38 = vpack.c.bf16 %v959_v37, %v958_v36 }
 0x24d   : > { %1668 = vmatpush3.bf16.msra.mxu1 %v1665_v41  ;;  %v957_v41 = vld [vmem:[#allocation11 + $0x68] sm:$0xff] }
 0x24e   : > { %1670 = vmatprep.subr.bf16.mxu1 %v1669_v43 }
 0x251   : > { %1672 = vmatpush3.bf16.msra.mxu1 %v1669_v43  ;;  %v1775_v43 = vpack.c.bf16 %v957_v41, %v956_v40  ;;  %v976_v41 = vld [vmem:[#allocation11 + $0x100] sm:$0xff] }
 0x252   : > { %1674 = vmatprep.subr.bf16.mxu1 %v1673_v47  ;;  %v1783_v28 = vpack.c.bf16 %v977_v42, %v976_v41 }
 0x255   : > { %1676 = vmatpush3.bf16.msra.mxu1 %v1673_v47 }
 0x256   : > { %1678 = vmatprep.subr.bf16.mxu1 %v1677_v49 }
 0x259   : > { %1680 = vmatpush3.bf16.msra.mxu1 %v1677_v49 }
 0x25a   : > { %1682 = vmatprep.subr.bf16.mxu1 %v1681_v52 }
 0x25d   : > { %1684 = vmatpush3.bf16.msra.mxu1 %v1681_v52 }
 0x25e   : > { %1750 = vmatprep.subr.bf16.mxu1 %v1749_v3  ;;  %v745_v3 = vld [vmem:[#allocation10 + $0xd8] sm:$0xff] }
 0x25f   : > { %v1729_v6 = vpack.c.bf16 %v749_v4, %v745_v3  ;;  %v1003_v3 = vld [vmem:[#allocation11 + $0x1d8] sm:$0xff] }
 0x260   : > { %1603 = vmatmul.mubr.f32.vlgmr.msra.gmra.mrb[0].mxu1 %v524_v53  ;;  %v1719_v53 = vpack.c.bf16 %v724_v48, %v720_v46  ;;  %v979_v46 = vld [vmem:[#allocation11 + $0x118] sm:$0xff] }
 0x261   : > { %1752 = vmatpush3.bf16.msra.mxu1 %v1751_v7  ;;  %v744_v7 = vld [vmem:[#allocation10 + $0xd0] sm:$0xff] }
 0x262   : > { %1754 = vmatprep.subr.bf16.mxu1 %v1753_v8  ;;  %v748_v8 = vld [vmem:[#allocation10 + $0xf0] sm:$0xff] }
 0x263   : > { %v1731_v11 = vpack.c.bf16 %v748_v8, %v744_v7  ;;  %v987_v7 = vld [vmem:[#allocation11 + $0x158] sm:$0xff]  ;;  %v1004_v8 = vld [vmem:[#allocation11 + $0x1e0] sm:$0xff] }
 0x265   : > { %1756 = vmatpush3.bf16.msra.mxu1 %v1755_v13  ;;  %v752_v13 = vld [vmem:[#allocation10 + $0x110] sm:$0xff] }
 0x266   : > { %1758 = vmatprep.subr.bf16.mxu1 %v1757_v14  ;;  %v756_v14 = vld [vmem:[#allocation10 + $0x130] sm:$0xff] }
 0x267   : > { %v1735_v17 = vpack.c.bf16 %v756_v14, %v752_v13  ;;  %v989_v13 = vld [vmem:[#allocation11 + $0x168] sm:$0xff]  ;;  %v1006_v14 = vld [vmem:[#allocation11 + $0x1f0] sm:$0xff] }
 0x269   : > { %1760 = vmatpush3.bf16.msra.mxu1 %v1759_v19  ;;  %v760_v19 = vld [vmem:[#allocation10 + $0x150] sm:$0xff] }
 0x26a   : > { %1762 = vmatprep.subr.bf16.mxu1 %v1761_v20  ;;  %v764_v20 = vld [vmem:[#allocation10 + $0x170] sm:$0xff] }
 0x26b   : > { %v1739_v23 = vpack.c.bf16 %v764_v20, %v760_v19  ;;  %v991_v19 = vld [vmem:[#allocation11 + $0x178] sm:$0xff] }
 0x26d   : > { %1764 = vmatpush3.bf16.msra.mxu1 %v1763_v25  ;;  %v768_v25 = vld [vmem:[#allocation10 + $0x190] sm:$0xff] }
 0x26e   : > { %1766 = vmatprep.subr.bf16.mxu1 %v1765_v26  ;;  %v772_v26 = vld [vmem:[#allocation10 + $0x1b0] sm:$0xff] }
 0x26f   : > { %v1743_v31 = vpack.c.bf16 %v772_v26, %v768_v25 }
 0x271   : > { %1768 = vmatpush3.bf16.msra.mxu1 %v1767_v33  ;;  %v776_v33 = vld [vmem:[#allocation10 + $0x1d0] sm:$0xff] }
 0x272   : > { %1770 = vmatprep.subr.bf16.mxu1 %v1769_v34  ;;  %v780_v34 = vld [vmem:[#allocation10 + $0x1f0] sm:$0xff] }
 0x273   : > { %v1747_v35 = vpack.c.bf16 %v780_v34, %v776_v33 }
 0x275   : > { %1772 = vmatpush3.bf16.msra.mxu1 %v1771_v39  ;;  %v992_v39 = vld [vmem:[#allocation11 + $0x180] sm:$0xff] }
 0x276   : > { %1774 = vmatprep.subr.bf16.mxu1 %v1773_v29  ;;  %v993_v29 = vld [vmem:[#allocation11 + $0x188] sm:$0xff] }
 0x277   : > { %v1781_v40 = vpack.c.bf16 %v993_v29, %v992_v39 }
 0x279   : > { %1776 = vmatpush3.bf16.msra.mxu1 %v1775_v43  ;;  %v994_v43 = vld [vmem:[#allocation11 + $0x190] sm:$0xff] }
 0x27a   : > { %1778 = vmatprep.subr.bf16.mxu1 %v1777_v44  ;;  %v995_v44 = vld [vmem:[#allocation11 + $0x198] sm:$0xff] }
 0x27d   : > { %1780 = vmatpush3.bf16.msra.mxu1 %v1779_v38 }
 0x333   : > { %v1604_v47 = vpop.f32.mrb[0].mxu1 }
 0x334   : > { %v705_v49 = vpop.f32.mrb[1].mxu1  ;;  %v2577_v54 = vadd.f32 %v1604_v47, %v1376_v45  ;;  %v978_v47 = vld [vmem:[#allocation11 + $0x110] sm:$0xff] }
 0x335   : > { %v2575_v52 = vadd.f32 %v1376_v45, %v705_v49  ;;  %v1785_v45 = vpack.c.bf16 %v995_v44, %v994_v43  ;;  %v1787_v48 = vpack.c.bf16 %v979_v46, %v978_v47  ;;  %v997_v49 = vld [vmem:[#allocation11 + $0x1a8] sm:$0xff] }
 0x336   : > { %v717_v62 = vmax.f32 %v2577_v54, 0.0  ;;  %v999_v54 = vld [vmem:[#allocation11 + $0x1b8] sm:$0xff] }
 0x337   : > { %v716_v55 = vmax.f32 %v2575_v52, 0.0  ;;  %v981_v52 = vld [vmem:[#allocation11 + $0x128] sm:$0xff] }
 0x339   : > { %847 = vmatmul.mubr.f32.vlgmr.msra.gmra.mrb[2].mxu0 %v716_v55 }
 0x33a   : > { %1720 = vmatpush1.bf16.msra.mxu0 %v1719_v53  ;;  %852 = vmatprep.mubr.f32.mxu0 %v2235_v63  ;;  %v998_v53 = vld [vmem:[#allocation11 + $0x1b0] sm:$0xff] }
 0x33b   : > { %1722 = vmatprep.subr.bf16.mxu0 %v1721_v56  ;;  %v1793_v56 = vpack.c.bf16 %v999_v54, %v998_v53 }
 0x33d   : > { %853 = vmatmul.mubr.f32.gmra.mrb[4].mxu0 %v717_v62 }
 0x33e   : > { %1724 = vmatpush1.bf16.msra.mxu0 %v1723_v61  ;;  %923 = vmatprep.mubr.f32.mxu0 %v2235_v63  ;;  %v1795_v61 = vpack.c.bf16 %v983_v58, %v982_v57 }
 0x33f   : > { %1726 = vmatprep.subr.bf16.mxu0 %v1725_v0  ;;  %v984_v0 = vld [vmem:[#allocation11 + $0x140] sm:$0xff] }
 0x340   : > { %v1799_v4 = vpack.c.bf16 %v985_v1, %v984_v0 }
 0x342   : > { %1728 = vmatpush1.bf16.msra.mxu0 %v1727_v5  ;;  %v1801_v5 = vpack.c.bf16 %v1003_v3, %v1002_v2 }
 0x343   : > { %1730 = vmatprep.subr.bf16.mxu0 %v1729_v6  ;;  %v986_v6 = vld [vmem:[#allocation11 + $0x150] sm:$0xff] }
 0x344   : > { %v1803_v10 = vpack.c.bf16 %v987_v7, %v986_v6 }
 0x346   : > { %1732 = vmatpush1.bf16.msra.mxu0 %v1731_v11  ;;  %v1805_v11 = vpack.c.bf16 %v1005_v9, %v1004_v8 }
 0x347   : > { %1734 = vmatprep.subr.bf16.mxu0 %v1733_v12  ;;  %v988_v12 = vld [vmem:[#allocation11 + $0x160] sm:$0xff] }
 0x348   : > { %v1807_v16 = vpack.c.bf16 %v989_v13, %v988_v12 }
 0x34a   : > { %1736 = vmatpush1.bf16.msra.mxu0 %v1735_v17  ;;  %v1809_v17 = vpack.c.bf16 %v1007_v15, %v1006_v14 }
 0x34b   : > { %1738 = vmatprep.subr.bf16.mxu0 %v1737_v18  ;;  %v990_v18 = vld [vmem:[#allocation11 + $0x170] sm:$0xff] }
 0x34c   : > { %v1811_v20 = vpack.c.bf16 %v991_v19, %v990_v18 }
 0x34e   : > { %1740 = vmatpush1.bf16.msra.mxu0 %v1739_v23 }
 0x34f   : > { %1742 = vmatprep.subr.bf16.mxu0 %v1741_v24 }
 0x352   : > { %1744 = vmatpush1.bf16.msra.mxu0 %v1743_v31 }
 0x353   : > { %1746 = vmatprep.subr.bf16.mxu0 %v1745_v32 }
 0x356   : > { %1748 = vmatpush1.bf16.msra.mxu0 %v1747_v35 }
 0x357   : > { %1782 = vmatprep.subr.bf16.mxu0 %v1781_v40 }
 0x359   : > { %924 = vmatmul.mubr.f32.vlgmr.msra.gmra.mrb[6].mxu0 %v716_v55  ;;  %v1791_v55 = vpack.c.bf16 %v981_v52, %v980_v50 }
 0x35a   : > { %929 = vmatprep.mubr.f32.mxu0 %v2235_v63  ;;  %1784 = vmatpush3.bf16.msra.mxu0 %v1783_v28  ;;  %v996_v63 = vld [vmem:[#allocation11 + $0x1a0] sm:$0xff] }
 0x35b   : > { %1786 = vmatprep.subr.bf16.mxu0 %v1785_v45  ;;  %v1789_v51 = vpack.c.bf16 %v997_v49, %v996_v63 }
 0x35d   : > { %930 = vmatmul.mubr.f32.gmra.mrb[8].mxu0 %v717_v62  ;;  %v1797_v62 = vpack.c.bf16 %v1001_v60, %v1000_v59 }
 0x35e   : > { %1788 = vmatpush3.bf16.msra.mxu0 %v1787_v48 }
 0x35f   : > { %1790 = vmatprep.subr.bf16.mxu0 %v1789_v51 }
 0x362   : > { %1792 = vmatpush3.bf16.msra.mxu0 %v1791_v55 }
 0x363   : > { %1794 = vmatprep.subr.bf16.mxu0 %v1793_v56 }
 0x366   : > { %1796 = vmatpush3.bf16.msra.mxu0 %v1795_v61 }
 0x367   : > { %1798 = vmatprep.subr.bf16.mxu0 %v1797_v62 }
 0x36a   : > { %1800 = vmatpush3.bf16.msra.mxu0 %v1799_v4 }
 0x36b   : > { %1802 = vmatprep.subr.bf16.mxu0 %v1801_v5 }
 0x36e   : > { %1804 = vmatpush3.bf16.msra.mxu0 %v1803_v10 }
 0x36f   : > { %1806 = vmatprep.subr.bf16.mxu0 %v1805_v11 }
 0x372   : > { %1808 = vmatpush3.bf16.msra.mxu0 %v1807_v16 }
 0x373   : > { %1810 = vmatprep.subr.bf16.mxu0 %v1809_v17 }
 0x376   : > { %1812 = vmatpush3.bf16.msra.mxu0 %v1811_v20 }
 0x40c   : > { %v848_v21 = vpop.f32.mrb[2].mxu0 }
 0x40d   : > { %936 = vst [vmem:[%s400_s23] sm:$0xff] %v848_v21  ;;  %v850_v22 = vpop.f32.mrb[3].mxu0 }
 0x40e   : > { %937 = vst [vmem:[%s400_s23 + $0x8] sm:$0xff] %v850_v22  ;;  %1072 = vmatprep.mubr.f32.mxu1 %v850_v22 }
 0x40f   : > { %1073 = vmatmul.mubr.f32.vlgmr.msra.gmra.mrb[2].mxu1 %v848_v21 }
 0x410   : > { %v854_v23 = vpop.f32.mrb[4].mxu0 }
 0x411   : > { %940 = vst [vmem:[%s400_s23 + $0x20] sm:$0xff] %v854_v23  ;;  %v856_v24 = vpop.f32.mrb[5].mxu0 }
 0x412   : > { %941 = vst [vmem:[%s400_s23 + $0x28] sm:$0xff] %v856_v24  ;;  %1077 = vmatprep.mubr.f32.mxu1 %v856_v24 }
 0x413   : > { %1078 = vmatmul.mubr.f32.gmra.mrb[4].mxu1 %v854_v23 }
 0x42c   : > { %v925_v25 = vpop.f32.mrb[6].mxu0 }
 0x42d   : > { %938 = vst [vmem:[%s400_s23 + $0x10] sm:$0xff] %v925_v25  ;;  %v927_v26 = vpop.f32.mrb[7].mxu0 }
 0x42e   : > { %939 = vst [vmem:[%s400_s23 + $0x18] sm:$0xff] %v927_v26  ;;  %1147 = vmatprep.mubr.f32.mxu0 %v927_v26 }
 0x42f   : > { %1148 = vmatmul.mubr.f32.vlgmr.msra.gmra.mrb[10].mxu0 %v925_v25 }
 0x430   : > { %v931_v27 = vpop.f32.mrb[8].mxu0 }
 0x431   : > { %942 = vst [vmem:[%s400_s23 + $0x30] sm:$0xff] %v931_v27  ;;  %v933_v30 = vpop.f32.mrb[9].mxu0 }
 0x432   : > { %943 = vst [vmem:[%s400_s23 + $0x38] sm:$0xff] %v933_v30  ;;  %1152 = vmatprep.mubr.f32.mxu0 %v933_v30 }
 0x433   : > { %1153 = vmatmul.mubr.f32.gmra.mrb[12].mxu0 %v931_v27 }
 0x434   : > { %2119 = shalt.err (!%p2116_p10)
}
 0x435   : > { %s2120_s13 = scalar_lea.hbm %s2591_s16, 1024  ;;  %s2124_s0 = scalar_lea.hbm %s2674_s7, 4096 }
 0x436   : > { %p2121_p8 = scmp.ne.s32.totalorder %s2591_s16, %s2120_s13  ;;  %p2125_p3 = scmp.lt.u32.totalorder %s2591_s16, %s2674_s7 }
 0x437   : > { %p2126_p7 = scmp.lt.u32.totalorder %s2124_s0, %s2120_s13  ;;  %p2128_p1 = scmp.lt.u32.totalorder %s2120_s13, %s2591_s16 }
 0x438   : > { %p2122_p6 = pnand %p2121_p8, %p2479_p5 }
 0x439   : > { %p2127_p11 = por %p2126_p7, %p2125_p3 }
 0x43a   : > { %p2123_p0 = pneg %p2122_p6 }
 0x43b   : > { %p2129_p2 = por %p2128_p1, %p2127_p11 }
 0x43d   : > { %p2130_p12 = pnand %p2129_p2, %p2123_p0 }
 0x43f   : > { %2133 = shalt.err (!%p2130_p12)
}
 0x440   : > { %s2237_s22 = smov 512   ;;  %s2238_s21 = smov 32  }
 0x441   : > { %1839 = dma.vmem_to_hbm [thread:$0]  (%p2479_p5), %s2585_s15, 1024, %s2591_s16, %s1161_s26, %s2237_s22, %s2237_s22, %s2238_s21  }
 0x442   : > { %s1372_s14 = sshll.u32 %s2533_s24, 4  ;;  %s1389_s11 = sshll.u32 %s2308_s9, 8 }
 0x443   : > { %s407_s17 = scalar_lea.vmem [#allocation14], %s1372_s14  ;;  %s2624_s26 = scalar_lea.hbm %s2675_s8, %s1389_s11 }
 0x444   : > { %s1196_s18 = sshll.u32 %s407_s17, 4  ;;  %s1166_s13 = scalar_lea.sflag [#allocation15], %s2533_s24  ;;  %s2619_s18 = int_to_ptr.vmem [resolvable:$true] %s1196_s18 }
 0x445   : > { %s2134_s20 = scalar_lea.vmem %s2619_s18, 256  ;;  %s2239_s9 = smov [#allocation14]  }
 0x446   : > { %p2135_p9 = scmp.ne.s32.totalorder %s2619_s18, %s2134_s20  ;;  %s2138_s19 = sshll.u32 %s2239_s9, 4  ;;  %s2139_s19 = int_to_ptr.vmem [resolvable:$false] %s2138_s19 }
 0x447   : > { %s2140_s0 = scalar_lea.vmem %s2139_s19, 512  ;;  %p2141_p10 = scmp.lt.s32.totalorder %s2619_s18, %s2139_s19 }
 0x448   : > { %p2136_p13 = pnand %p2135_p9, %p2479_p5  ;;  %p2142_p8 = scmp.lt.s32.totalorder %s2140_s0, %s2134_s20 }
 0x44a   : > { %p2137_p4 = pneg %p2136_p13  ;;  %p2143_p6 = por %p2142_p8, %p2141_p10 }
 0x44c   : > { %p2144_p0 = pnand %p2143_p6, %p2137_p4 }
 0x4e2   : > { %v1472_v31 = vpop.f32.mrb[2].mxu1 }
 0x4e3   : > { %v1473_v32 = vpop.f32.mrb[3].mxu1 }
 0x4e4   : > { %v1474_v33 = vadd.f32 %v1473_v32, %v1472_v31 }
 0x4e6   : > { %v1475_v34 = vpop.f32.mrb[4].mxu1 }
 0x4e7   : > { %v1476_v35 = vpop.f32.mrb[5].mxu1 }
 0x4e8   : > { %v1477_v36 = vadd.f32 %v1476_v35, %v1475_v34 }
 0x502   : > { %v1510_v37 = vpop.f32.mrb[10].mxu0 }
 0x503   : > { %v1511_v38 = vpop.f32.mrb[11].mxu0 }
 0x504   : > { %v1512_v39 = vadd.f32 %v1511_v38, %v1510_v37 }
 0x506   : > { %v1150_v29 = vadd.f32 %v1512_v39, %v1474_v33  ;;  %v1513_v40 = vpop.f32.mrb[12].mxu0 }
 0x507   : > { %v1514_v41 = vpop.f32.mrb[13].mxu0 }
 0x508   : > { %1158 = vst [vmem:[%s407_s17] sm:$0xff] %v1150_v29  ;;  %v1515_v42 = vadd.f32 %v1514_v41, %v1513_v40 }
 0x50a   : > { %v1155_v28 = vadd.f32 %v1515_v42, %v1477_v36 }
 0x50c   : > { %1159 = vst [vmem:[%s407_s17 + $0x8] sm:$0xff] %v1155_v28 }
 0x50d   : > { %2147 = shalt.err (!%p2144_p0)
}
 0x50e   : > { %s2148_s23 = scalar_lea.hbm %s2624_s26, 256  ;;  %s2152_s21 = scalar_lea.hbm %s2675_s8, 1024 }
 0x50f   : > { %p2149_p3 = scmp.ne.s32.totalorder %s2624_s26, %s2148_s23  ;;  %p2153_p1 = scmp.lt.u32.totalorder %s2624_s26, %s2675_s8 }
 0x510   : > { %p2154_p2 = scmp.lt.u32.totalorder %s2152_s21, %s2148_s23  ;;  %p2156_p9 = scmp.lt.u32.totalorder %s2148_s23, %s2624_s26 }
 0x511   : > { %p2150_p7 = pnand %p2149_p3, %p2479_p5 }
 0x512   : > { %p2155_p12 = por %p2154_p2, %p2153_p1 }
 0x513   : > { %p2151_p11 = pneg %p2150_p7 }
 0x514   : > { %p2157_p13 = por %p2156_p9, %p2155_p12 }
 0x516   : > { %p2158_p4 = pnand %p2157_p13, %p2151_p11 }
 0x518   : > { %2161 = shalt.err (!%p2158_p4)
}
 0x519   : > { %s2240_s11 = smov 128   ;;  %s2241_s15 = smov 8  }
 0x51a   : > { %1840 = dma.vmem_to_hbm [thread:$0]  (%p2479_p5), %s2619_s18, 256, %s2624_s26, %s1166_s13, %s2240_s11, %s2240_s11, %s2241_s15  }
 0x51b PF: > { %s2707_s16 = sld [smem:[#allocation23_spill]]  ;;  %s2708_s20 = sld [smem:[#allocation24_spill]] }
 0x51c   : > { %p1881_p10 = scmp.ge.s32.totalorder %s2220_s30, 2 }
 0x521   : > { %s1211_s9 = sand.u32 1, %s2707_s16   ;;  %p2709_p8 = scmp.ne.s32.totalorder %s2708_s20, 0 }
 0x522   : > { %s1212_s19 = scalar_lea.sflag [#allocation4], %s1211_s9 }
 0x523   : > { %p1864_p6 = pnand %p1881_p10, %p2709_p8 }
 0x525   : > { %2199 = dma.done.wait (!%p1864_p6), %s1212_s19, 1024  }
 0x526   : > { %2201 = vsyncadd (!%p1864_p6), %s1212_s19, 4294966272  ;;  %s1221_s0 = scalar_lea.sflag [#allocation15], %s1211_s9 }
 0x527   : > { %2203 = dma.done.wait (!%p1864_p6), %s1221_s0, 256  }
 0x528   : > { %2205 = vsyncadd (!%p1864_p6), %s1221_s0, 4294967040  ;;  %s2710_s12 = smov %s2475_s27  ;;  %p28_p5 = scmp.ge.s32.totalorder %s2444_s10, 6  }
 0x529   : > { %s2711_s27 = smov %s2212_s28  ;;  %s2712_s28 = smov %s2216_s29 }
 0x52a   : > { %s2713_s29 = smov %s2710_s12  ;;  %s2714_s30 = smov %s2444_s10 }
 0x52b   :  { %30 = sbr.rel (!%p28_p5) target bundleno = 12 (0xc), region = 132 }
 0x532   :  { %1226 = vsyncpa [#allocation3], 1 }
 0x533   :  { %1228 = vsyncpa [#allocation3 + $0x1], 1 }
 0x534   :  { %1229 = vsyncpa [#allocation6], 1 }
 0x535   :  { %1231 = vsyncpa [#allocation6 + $0x1], 1 }
 0x536   :  { %1232 = vsyncpa [#allocation9], 1 }
 0x537   :  { %1233 = vsyncpa [#allocation12], 1 }
 0x538   :  { %1234 = vsyncpa [#allocation4], 1 }
 0x539   :  { %1236 = vsyncpa [#allocation4 + $0x1], 1 }
 0x53a   :  { %1237 = vsyncpa [#allocation15], 1 }
 0x53b   :  { %1239 = vsyncpa [#allocation15 + $0x1], 1 }

</bundles_post_ra>
